<compile_context>
chip_gen: v7x
topology: tpu7x:2x2x1
jax: 0.10.0
libtpu: 0.0.40
codegen_flags: <defaults>
</compile_context>

<pallas_src>
import jax
import jax.numpy as jnp
from jax import lax
from jax.experimental import pallas as pl
from jax.experimental.pallas import tpu as pltpu


def _vmem_capacity_bytes():
    try:
        return int(pltpu.get_tpu_info().vmem_capacity_bytes)
    except Exception:
        return 64 * 1024 * 1024  # conservative default (v7x per-TC VMEM)


def _sublane_multiple(dtype):
    bits = jnp.dtype(dtype).itemsize * 8
    return max(8, 256 // bits)  # f32 -> 8, bf16 -> 16, int8/fp8 -> 32


def base_model_forward(x, weight, bias, *, max_block_bytes=None):
    """x: (B, C, D, H, W) f32/bf16 -> (B, num_classes) f32.

    Global average pool over (D, H, W) + linear head.
    """
    B, C, D, H, W = x.shape
    S = D * H * W
    itemsize = jnp.dtype(x.dtype).itemsize

    vmem_cap = _vmem_capacity_bytes()
    if max_block_bytes is None:
        # One streamed input block (double-buffered by Pallas). 16 MiB blocks
        # on v5e/v6e/v7x amortize the ~0.35 us per-grid-step overhead against
        # multi-us DMA steps while leaving ample VMEM headroom.
        max_block_bytes = int(min(16 * 1024 * 1024, vmem_cap // 4))

    # Padded VMEM footprint of one (H, W) slab in native (sublane, lane) tiling.
    sub = _sublane_multiple(x.dtype)
    h_pad_in = -(-H // sub) * sub
    w_pad = -(-W // 128) * 128
    slab_bytes = h_pad_in * w_pad * itemsize

    tD = max(1, min(D, max_block_bytes // slab_bytes))
    n_d = -(-D // tD)
    ragged = (D % tD) != 0

    def pool_kernel(x_ref, o_ref):
        d = pl.program_id(2)

        @pl.when(d == 0)
        def _():
            o_ref[...] = jnp.zeros_like(o_ref)

        xt = x_ref[...].astype(jnp.float32)  # (tD, H, W)
        if ragged:
            # Only the final depth tile is ragged; the where is a numeric
            # no-op for full tiles and the kernel is HBM-bound anyway.
            rem = D - d * tD
            idx = lax.broadcasted_iota(jnp.int32, xt.shape, 0)
            xt = jnp.where(idx < rem, xt, 0.0)
        # Pure VPU adds (reduction over the non-lane tD axis); the cross-lane
        # (H, W) reduce happens once, outside the kernel, on a tiny array.
        o_ref[...] += jnp.sum(xt, axis=0)

    # VMEM budget: 2x double-buffered input block + 2x output slab + slack,
    # clamped below the physical VMEM of this generation.
    in_block_bytes = tD * slab_bytes
    out_block_bytes = (-(-H // 8) * 8) * w_pad * 4
    vmem_need = 2 * in_block_bytes + 2 * out_block_bytes + (2 << 20)
    vmem_limit = int(min(max(vmem_need, 16 << 20), vmem_cap - (2 << 20)))

    partial = pl.pallas_call(
        pool_kernel,
        out_shape=jax.ShapeDtypeStruct((B, C, H, W), jnp.float32),
        grid_spec=pltpu.PrefetchScalarGridSpec(
            num_scalar_prefetch=0,
            grid=(B, C, n_d),
            in_specs=[pl.BlockSpec((None, None, tD, H, W),
                                   lambda b, c, d: (b, c, d, 0, 0))],
            # Same block index for every d -> the f32 output slab stays
            # resident in VMEM across the depth reduction and doubles as the
            # accumulator (no separate scratch needed).
            out_specs=pl.BlockSpec((None, None, H, W),
                                   lambda b, c, d: (b, c, 0, 0)),
        ),
        compiler_params=pltpu.CompilerParams(
            dimension_semantics=("parallel", "parallel", "arbitrary"),
            vmem_limit_bytes=vmem_limit,
        ),
        cost_estimate=pl.CostEstimate(
            flops=B * C * D * H * W,
            transcendentals=0,
            bytes_accessed=B * C * D * H * W * itemsize + B * C * H * W * 4,
        ),
    )(x)

    # Finalize: tiny (B, C, H, W) cross-lane reduce + 1/S scale + linear head.
    # Left to XLA -- numerically free next to streaming the full volume.
    pooled = jnp.sum(partial, axis=(2, 3)) * (1.0 / S)                 # (B, C)
    logits = pooled @ weight.astype(jnp.float32) + bias.astype(jnp.float32)
    return logits


def reference_forward(x, weight, bias):
    """Pure-JAX reference of the same head (correctness check)."""
    pooled = jnp.mean(x.astype(jnp.float32), axis=(2, 3, 4))   # (B, C)
    return pooled @ weight.astype(jnp.float32) + bias.astype(jnp.float32)


if __name__ == "__main__":
    num_classes = 3
    B, C, D, H, W = 2, 4, 8, 16, 16          # small (B, C, depth, height, width)

    key = jax.random.PRNGKey(0)
    kx, kw, kb = jax.random.split(key, 3)
    x = jax.random.normal(kx, (B, C, D, H, W), dtype=jnp.float32)
    # Deterministic parameter init (synthetic; no checkpoint load).
    weight = jax.random.normal(kw, (C, num_classes), dtype=jnp.float32) * 0.1
    bias = jax.random.normal(kb, (num_classes,), dtype=jnp.float32) * 0.01

    ref = reference_forward(x, weight, bias)

    # 1) Default per-generation block sizing (single depth step at this size).
    out = jax.block_until_ready(base_model_forward(x, weight, bias))
    assert out.shape == (B, num_classes), out.shape
    assert jnp.allclose(out, ref, atol=2e-5, rtol=1e-5), (out, ref)

    # 2) Force tD=3 over D=8 -> multi-step accumulation with a ragged, in-kernel
    #    masked final depth tile (no padded HBM copy anywhere).
    slab = 16 * 128 * 4  # padded (H, W) slab bytes for f32 at H=W=16
    out_tiled = jax.block_until_ready(
        base_model_forward(x, weight, bias, max_block_bytes=3 * slab)
    )
    assert out_tiled.shape == (B, num_classes), out_tiled.shape
    assert jnp.allclose(out_tiled, ref, atol=2e-5, rtol=1e-5), (out_tiled, ref)

    # 3) bf16 input path (per-tile upcast, f32 accumulation).
    x_bf16 = x.astype(jnp.bfloat16)
    ref_bf16 = reference_forward(x_bf16, weight, bias)
    out_bf16 = jax.block_until_ready(base_model_forward(x_bf16, weight, bias))
    assert out_bf16.shape == (B, num_classes), out_bf16.shape
    assert jnp.allclose(out_bf16, ref_bf16, atol=1e-4, rtol=1e-4), (out_bf16, ref_bf16)

    print("KERNEL_OK")
</pallas_src>

<mosaic_0001>
module attributes {stable_mosaic.version = 11 : i64} {
  func.func @pool_kernel(%arg0: i32, %arg1: i32, %arg2: i32, %arg3: memref<1x1x8x16x16xf32, #tpu.memory_space<vmem>>, %arg4: memref<1x1x16x16xf32, #tpu.memory_space<vmem>>) attributes {dimension_semantics = [#tpu.dimension_semantics<parallel>, #tpu.dimension_semantics<parallel>, #tpu.dimension_semantics<arbitrary>], iteration_bounds = array<i64: 2, 4, 1>, scalar_prefetch = 0 : i64, scratch_operands = 0 : i64, tpu.core_type = #tpu.core_type<tc>, window_params = [{transform_indices = @transform_0, window_bounds = array<i64: 1, 1, 8, 16, 16>}, {transform_indices = @transform_1, window_bounds = array<i64: 1, 1, 16, 16>}]} {
    %c0_i32 = arith.constant 0 : i32
    %0 = arith.cmpi eq, %arg2, %c0_i32 : i32
    %1 = arith.extui %0 : i1 to i32
    %c0_i32_0 = arith.constant 0 : i32
    %2 = arith.cmpi ne, %1, %c0_i32_0 : i32
    scf.if %2 {
      %cst_13 = arith.constant 0.000000e+00 : f32
      %12 = vector.broadcast %cst_13 : f32 to vector<16x16xf32>
      %c0_14 = arith.constant 0 : index
      %c0_15 = arith.constant 0 : index
      %c0_16 = arith.constant 0 : index
      %c0_17 = arith.constant 0 : index
      %13 = vector.load %arg4[%c0_14, %c0_15, %c0_16, %c0_17] : memref<1x1x16x16xf32, #tpu.memory_space<vmem>>, vector<1x1x16x16xf32>
      %14 = vector.shape_cast %13 : vector<1x1x16x16xf32> to vector<16x16xf32>
      %15 = vector.shape_cast %12 : vector<16x16xf32> to vector<1x1x16x16xf32>
      tpu.vector_store %arg4[%c0_14, %c0_15, %c0_16, %c0_17], %15 {strides = array<i32>} : memref<1x1x16x16xf32, #tpu.memory_space<vmem>>, vector<1x1x16x16xf32>,
    } else {
    }
    %c0 = arith.constant 0 : index
    %c0_1 = arith.constant 0 : index
    %c0_2 = arith.constant 0 : index
    %c0_3 = arith.constant 0 : index
    %c0_4 = arith.constant 0 : index
    %3 = vector.load %arg3[%c0, %c0_1, %c0_2, %c0_3, %c0_4] : memref<1x1x8x16x16xf32, #tpu.memory_space<vmem>>, vector<1x1x8x16x16xf32>
    %4 = vector.shape_cast %3 : vector<1x1x8x16x16xf32> to vector<8x16x16xf32>
    %c0_5 = arith.constant 0 : index
    %c0_6 = arith.constant 0 : index
    %c0_7 = arith.constant 0 : index
    %c0_8 = arith.constant 0 : index
    %5 = vector.load %arg4[%c0_5, %c0_6, %c0_7, %c0_8] : memref<1x1x16x16xf32, #tpu.memory_space<vmem>>, vector<1x1x16x16xf32>
    %6 = vector.shape_cast %5 : vector<1x1x16x16xf32> to vector<16x16xf32>
    %cst = arith.constant dense<0.000000e+00> : vector<16x16xf32>
    %7 = vector.multi_reduction <add>, %4, %cst [0] : vector<8x16x16xf32> to vector<16x16xf32>
    %8 = arith.addf %6, %7 : vector<16x16xf32>
    %c0_9 = arith.constant 0 : index
    %c0_10 = arith.constant 0 : index
    %c0_11 = arith.constant 0 : index
    %c0_12 = arith.constant 0 : index
    %9 = vector.load %arg4[%c0_9, %c0_10, %c0_11, %c0_12] : memref<1x1x16x16xf32, #tpu.memory_space<vmem>>, vector<1x1x16x16xf32>
    %10 = vector.shape_cast %9 : vector<1x1x16x16xf32> to vector<16x16xf32>
    %11 = vector.shape_cast %8 : vector<16x16xf32> to vector<1x1x16x16xf32>
    tpu.vector_store %arg4[%c0_9, %c0_10, %c0_11, %c0_12], %11 {strides = array<i32>} : memref<1x1x16x16xf32, #tpu.memory_space<vmem>>, vector<1x1x16x16xf32>,
    return
  }
  func.func @transform_0(%arg0: i32, %arg1: i32, %arg2: i32) -> (i32, i32, i32, i32, i32) {
    %c0_i32 = arith.constant 0 : i32
    %c0_i32_0 = arith.constant 0 : i32
    %c0_i32_1 = arith.constant 0 : i32
    return %arg0, %arg1, %arg2, %c0_i32, %c0_i32_0 : i32, i32, i32, i32, i32
  }
  func.func @transform_1(%arg0: i32, %arg1: i32, %arg2: i32) -> (i32, i32, i32, i32) {
    %c0_i32 = arith.constant 0 : i32
    %c0_i32_0 = arith.constant 0 : i32
    %c0_i32_1 = arith.constant 0 : i32
    return %arg0, %arg1, %c0_i32, %c0_i32_0 : i32, i32, i32, i32
  }
}

</mosaic_0001>

<bundles_post_ra>
// kernel: tpu_custom_call.1
= control target key start
LH: loop header
LB: loop body
LE: loop exit
PB: predicated region body
PF: predicated region fallthrough
CT: control target
= control target key end

     0   :  { %6 = vsyncpa [#allocation3], 0  ;;  %s827_s0 = inlined_call_operand.hbm [shape: f32[2,4,8,16,16], index: 0, kind: input, shape index: {}]   ;;  %s828_s1 = inlined_call_operand.hbm [shape: f32[2,4,16,16], index: 1, kind: output, shape index: {}]  }
   0x1   :  { %8 = vsyncpa [#allocation3 + $0x1], 0 }
   0x2   :  { %9 = vsyncpa [#allocation4], 0 }
   0x3   :  { %11 = vsyncpa [#allocation4 + $0x1], 0  ;;  %s584_s6 = smov 0   ;;  %s586_s7 = smov 0  }
   0x4   :  { %s588_s8 = smov 0   ;;  %s590_s9 = smov 0  }
   0x5   :  { %s592_s10 = smov 0   ;;  %s594_s11 = smov 0  }
   0x6   :  { %s596_s12 = smov 0   ;;  %s598_s13 = smov 0  }
   0x7 LB: > { %s337_s14 = sadd.s32 4294967295, %s565_s13   ;;  %s338_s15 = sadd.s32 4294967294, %s565_s13   ;;  %s565_s13 = sphi %s598_s13, %s17_s13   ;;  %s561_s12 = sphi %s596_s12, %s843_s12   ;;  %s557_s11 = sphi %s594_s11, %s842_s11   ;;  %s553_s10 = sphi %s592_s10, %s841_s10   ;;  %s549_s9 = sphi %s590_s9, %s840_s9   ;;  %s545_s8 = sphi %s588_s8, %s839_s8   ;;  %s541_s7 = sphi %s586_s7, %s838_s7   ;;  %s537_s6 = sphi %s584_s6, %s837_s6  }
   0x8   : > { %s32_s16 = sadd.s32 1, %s557_s11  ;;  %s36_s17 = sadd.s32 1, %s561_s12 }
   0x9   : > { %p34_p0 = scmp.ge.s32.totalorder %s32_s16, 4  ;;  %s47_s18 = sadd.s32 1, %s545_s8 }
   0xa   : > { %p54_p1 = scmp.ne.s32.totalorder %s545_s8, %s541_s7  ;;  %p55_p2 = scmp.eq.s32.totalorder %s565_s13, 0 }
   0xb   : > { %s845_s16 = smov (%p34_p0, %s32_s16), 0  ;;  %s847_s17 = smov (!%p34_p0, %s36_s17), %s561_s12 }
   0xc   : > { %s41_s19 = ssub.s32 %s557_s11, %s845_s16  ;;  %p637_p3 = por %p55_p2, %p54_p1 }
   0xd   : > { %p38_p4 = scmp.ge.s32.totalorder %s847_s17, 2  ;;  %p60_p5 = scmp.ne.s32.totalorder %s541_s7, %s537_s6 }
   0xe   : > { %p61_p6 = scmp.eq.s32.totalorder %s337_s14, 0  ;;  %p86_p7 = scmp.eq.s32.totalorder %s337_s14, 7 }
   0xf   : > { %s849_s17 = smov (%p38_p4, %s847_s17), 0  ;;  %p92_p10 = scmp.eq.s32.totalorder %s338_s15, 7 }
  0x10   : > { %p645_p8 = por %p61_p6, %p60_p5  ;;  %p649_p9 = por %p86_p7, %p54_p1 }
  0x11   : > { %s40_s23 = ssub.s32 %s561_s12, %s849_s17  ;;  %p655_p12 = por %p92_p10, %p60_p5 }
  0x12   : > { %s832_s22 = scalar_select %p649_p9, 1, 0 }
  0x13   : > { %s42_s24 = sor.u32 %s41_s19, %s40_s23  ;;  %p366_p13 = scmp.lt.s32.totalorder %s565_s13, 8 }
  0x14   : > { %p45_p11 = scmp.eq.s32.totalorder %s42_s24, 0  ;;  %s112_s26 = sand.u32 1, %s545_s8  }
  0x15   : > { %s833_s25 = scalar_select %p655_p12, 1, 0 }
  0x16   : > { %s662_s27 = scalar_select %p45_p11, %s545_s8, %s47_s18  }
  0x17   : > { %s341_s28 = sshll.u32 %s112_s26, 7  ;;  %s342_s29 = sshll.u32 %s557_s11, 4 }
  0x18   : > { %s343_s30 = sshll.u32 %s561_s12, 6  ;;  %s116_s2 = scalar_lea.vmem [#allocation2], %s341_s28 }
  0x19   : > { %s128_s3 = sshll.u32 %s116_s2, 4  ;;  %s125_s4 = sadd.s32 %s343_s30, %s342_s29  ;;  %s666_s3 = int_to_ptr.vmem [resolvable:$true] %s128_s3 }
  0x1a   : > { %s344_s5 = sshll.u32 %s125_s4, 7  ;;  %p670_p0 = pnand %p366_p13, %p637_p3 }
  0x1b   : > { %s677_s18 = scalar_lea.hbm %s827_s0, %s344_s5  ;;  %s679_s23 = scalar_lea.sflag [#allocation3], %s112_s26 }
  0x1c   : > { %s437_s24 = scalar_lea.hbm %s677_s18, 2048  ;;  %p439_p2 = pneg %p670_p0 }
  0x1d   : > { %p438_p1 = scmp.ne.s32.totalorder %s677_s18, %s437_s24  ;;  %s442_s29 = scalar_lea.hbm %s827_s0, 16384 }
  0x1e   : > { %p443_p5 = scmp.lt.u32.totalorder %s677_s18, %s827_s0  ;;  %p444_p6 = scmp.lt.u32.totalorder %s442_s29, %s437_s24 }
  0x1f   : > { %p440_p3 = pnand %p439_p2, %p438_p1  ;;  %p446_p10 = scmp.lt.u32.totalorder %s437_s24, %s677_s18 }
  0x20   : > { %p445_p7 = por %p444_p6, %p443_p5 }
  0x21   : > { %p441_p4 = pneg %p440_p3 }
  0x22   : > { %p447_p11 = por %p446_p10, %p445_p7 }
  0x24   : > { %p448_p13 = pnand %p447_p11, %p441_p4 }
  0x26   : > { %451 = shalt.err (!%p448_p13)
}
  0x27   : > { %s452_s26 = scalar_lea.vmem %s666_s3, 2048  ;;  %s567_s4 = smov [#allocation2]  }
  0x28   : > { %p453_p1 = scmp.ne.s32.totalorder %s666_s3, %s452_s26  ;;  %s457_s5 = sshll.u32 %s567_s4, 4  ;;  %s458_s5 = int_to_ptr.vmem [resolvable:$false] %s457_s5 }
  0x29   : > { %s459_s15 = scalar_lea.vmem %s458_s5, 4096  ;;  %p460_p9 = scmp.lt.s32.totalorder %s666_s3, %s458_s5 }
  0x2a   : > { %p455_p3 = pnand %p453_p1, %p439_p2  ;;  %p461_p5 = scmp.lt.s32.totalorder %s459_s15, %s452_s26 }
  0x2c   : > { %p456_p12 = pneg %p455_p3  ;;  %p462_p6 = por %p461_p5, %p460_p9 }
  0x2e   : > { %p463_p7 = pnand %p462_p6, %p456_p12 }
  0x30   : > { %466 = shalt.err (!%p463_p7)
}
  0x31   : > { %s568_s19 = smov 128   ;;  %s569_s24 = smov 8  }
  0x32   : > { %361 = dma.hbm_to_vmem [thread:$0]  (!%p670_p0), %s677_s18, 2048, %s666_s3, %s679_s23, %s568_s19, %s568_s19, %s569_s24  }
  0x33   : > { %p345_p2 = scmp.ge.s32.totalorder %s565_s13, 1  ;;  %p136_p4 = scmp.lt.s32.totalorder %s565_s13, 9 }
  0x35   : > { %p137_p10 = pnand %p345_p2, %p136_p4 }
  0x36   : > { %s710_s20 = sand.u32 (!%p137_p10), 1, %s541_s7  }
  0x37   : > { %140 = sbr.rel (%p137_p10) target bundleno = 98 (0x62), region = 24  ;;  %s346_s28 = sshll.u32 (!%p137_p10), %s710_s20, 7 }
  0x38   : > { %s143_s29 = scalar_lea.sflag (!%p137_p10), [#allocation3], %s710_s20  ;;  %s714_s30 = scalar_lea.vmem (!%p137_p10), [#allocation2], %s346_s28 }
  0x3e   : > { %528 = dma.done.wait (%p645_p8), %s143_s29, 2048  }
  0x3f   : > { %530 = vsyncadd (%p645_p8), %s143_s29, 4294965248  ;;  %s347_s3 = sshll.u32 %s710_s20, 4  ;;  %vm170_vm0 = vcmask 130048   ;;  %v570_v0 = vmov 0.0   ;;  %v173_v1 = vld [vmem:[%s714_s30] sm:$0xff]  ;;  %v175_v2 = vld [vmem:[%s714_s30 + $0x10] sm:$0xff] }
  0x40   : > { %s721_s14 = scalar_lea.vmem [#allocation5], %s347_s3  ;;  %v177_v3 = vld [vmem:[%s714_s30 + $0x20] sm:$0xff]  ;;  %v179_v4 = vld [vmem:[%s714_s30 + $0x30] sm:$0xff]  ;;  %v192_v5 = vsel %vm170_vm0, %v173_v1, 0.0  ;;  %v193_v6 = vsel %vm170_vm0, %v175_v2, 0.0  ;;  %v174_v11 = vld [vmem:[%s714_s30 + $0x8] sm:$0xff] }
  0x41   : > { %171 = vst.msk [vmem:[%s721_s14] sm:$0xff] %vm170_vm0, %v570_v0  ;;  %172 = vst.msk [vmem:[%s721_s14 + $0x8] sm:$0xff] %vm170_vm0, %v570_v0  ;;  %v195_v7 = vsel %vm170_vm0, %v177_v3, 0.0  ;;  %v181_v8 = vld [vmem:[%s714_s30 + $0x40] sm:$0xff]  ;;  %v194_v9 = vadd.f32 %v193_v6, %v192_v5  ;;  %v197_v10 = vsel %vm170_vm0, %v179_v4, 0.0  ;;  %v176_v12 = vld [vmem:[%s714_s30 + $0x18] sm:$0xff] }
  0x42   : > { %v178_v13 = vld [vmem:[%s714_s30 + $0x28] sm:$0xff]  ;;  %v183_v14 = vld [vmem:[%s714_s30 + $0x50] sm:$0xff]  ;;  %v180_v16 = vld [vmem:[%s714_s30 + $0x38] sm:$0xff]  ;;  %v207_v17 = vsel %vm170_vm0, %v174_v11, 0.0  ;;  %v208_v18 = vsel %vm170_vm0, %v176_v12, 0.0  ;;  %v199_v20 = vsel %vm170_vm0, %v181_v8, 0.0 }
  0x43   : > { %v196_v15 = vadd.f32 %v195_v7, %v194_v9  ;;  %v210_v19 = vsel %vm170_vm0, %v178_v13, 0.0  ;;  %v182_v21 = vld [vmem:[%s714_s30 + $0x48] sm:$0xff]  ;;  %v209_v22 = vadd.f32 %v208_v18, %v207_v17  ;;  %v185_v23 = vld [vmem:[%s714_s30 + $0x60] sm:$0xff]  ;;  %v212_v25 = vsel %vm170_vm0, %v180_v16, 0.0  ;;  %v184_v27 = vld [vmem:[%s714_s30 + $0x58] sm:$0xff]  ;;  %s349_s21 = sshll.u32 %s549_s9, 1 }
  0x44   : > { %v201_v26 = vsel %vm170_vm0, %v183_v14, 0.0  ;;  %v187_v29 = vld [vmem:[%s714_s30 + $0x70] sm:$0xff]  ;;  %v214_v31 = vsel %vm170_vm0, %v182_v21, 0.0  ;;  %v203_v32 = vsel %vm170_vm0, %v185_v23, 0.0  ;;  %v186_v33 = vld [vmem:[%s714_s30 + $0x68] sm:$0xff]  ;;  %v216_v36 = vsel %vm170_vm0, %v184_v27, 0.0 }
  0x45   : > { %v198_v24 = vadd.f32 %v197_v10, %v196_v15  ;;  %v211_v28 = vadd.f32 %v210_v19, %v209_v22  ;;  %s350_s18 = sshll.u32 %s553_s10, 3  ;;  %v205_v37 = vsel %vm170_vm0, %v187_v29, 0.0  ;;  %v188_v38 = vld [vmem:[%s714_s30 + $0x78] sm:$0xff]  ;;  %v218_v41 = vsel %vm170_vm0, %v186_v33, 0.0  ;;  %s242_s9 = sshll.u32 %s721_s14, 4  ;;  %s766_s9 = int_to_ptr.vmem [resolvable:$true] %s242_s9 }
  0x46   : > { %s239_s23 = sadd.s32 %s350_s18, %s349_s21  ;;  %v220_v45 = vsel %vm170_vm0, %v188_v38, 0.0  ;;  %s227_s5 = scalar_lea.sflag [#allocation4], %s710_s20 }
  0x47   : > { %v200_v30 = vadd.f32 %v199_v20, %v198_v24  ;;  %v213_v34 = vadd.f32 %v212_v25, %v211_v28  ;;  %s351_s10 = sshll.u32 %s239_s23, 7  ;;  %s467_s15 = scalar_lea.vmem %s766_s9, 256 }
  0x48   : > { %v189_v42 = vld [vmem:[%s721_s14] sm:$0xff]  ;;  %v190_v48 = vld [vmem:[%s721_s14 + $0x8] sm:$0xff]  ;;  %s771_s4 = scalar_lea.hbm %s828_s1, %s351_s10  ;;  %p468_p8 = scmp.ne.s32.totalorder %s766_s9, %s467_s15 }
  0x49   : > { %v202_v35 = vadd.f32 %v201_v26, %v200_v30  ;;  %v215_v39 = vadd.f32 %v214_v31, %v213_v34  ;;  %p835_p9 = scmp.ne.s32.totalorder %s832_s22, 0  ;;  %s571_s19 = smov [#allocation5]  }
  0x4a   : > { %s471_s24 = sshll.u32 %s571_s19, 4  ;;  %s472_s24 = int_to_ptr.vmem [resolvable:$false] %s471_s24 }
  0x4b   : > { %v204_v40 = vadd.f32 %v203_v32, %v202_v35  ;;  %v217_v43 = vadd.f32 %v216_v36, %v215_v39  ;;  %p469_p12 = pnand %p468_p8, %p835_p9  ;;  %s473_s28 = scalar_lea.vmem %s472_s24, 512 }
  0x4c   : > { %p474_p11 = scmp.lt.s32.totalorder %s766_s9, %s472_s24  ;;  %p475_p13 = scmp.lt.s32.totalorder %s473_s28, %s467_s15 }
  0x4d   : > { %v206_v44 = vadd.f32 %v205_v37, %v204_v40  ;;  %v219_v46 = vadd.f32 %v218_v41, %v217_v43  ;;  %p470_p0 = pneg %p469_p12 }
  0x4e   : > { %p476_p1 = por %p475_p13, %p474_p11 }
  0x4f   : > { %v222_v47 = vadd.f32 %v206_v44, %v189_v42  ;;  %v221_v49 = vadd.f32 %v220_v45, %v219_v46 }
  0x50   : > { %p477_p3 = pnand %p476_p1, %p470_p0 }
  0x51   : > { %224 = vst.msk [vmem:[%s721_s14] sm:$0xff] %vm170_vm0, %v222_v47  ;;  %v223_v50 = vadd.f32 %v221_v49, %v190_v48 }
  0x53   : > { %225 = vst.msk [vmem:[%s721_s14 + $0x8] sm:$0xff] %vm170_vm0, %v223_v50 }
  0x54   : > { %480 = shalt.err (!%p477_p3)
}
  0x55   : > { %s481_s29 = scalar_lea.hbm %s771_s4, 256  ;;  %s485_s14 = scalar_lea.hbm %s828_s1, 2048 }
  0x56   : > { %p482_p5 = scmp.ne.s32.totalorder %s771_s4, %s481_s29  ;;  %p486_p2 = scmp.lt.u32.totalorder %s771_s4, %s828_s1 }
  0x57   : > { %p487_p4 = scmp.lt.u32.totalorder %s485_s14, %s481_s29  ;;  %p489_p8 = scmp.lt.u32.totalorder %s481_s29, %s771_s4 }
  0x58   : > { %p483_p6 = pnand %p482_p5, %p835_p9 }
  0x59   : > { %p488_p10 = por %p487_p4, %p486_p2 }
  0x5a   : > { %p484_p7 = pneg %p483_p6 }
  0x5b   : > { %p490_p12 = por %p489_p8, %p488_p10 }
  0x5d   : > { %p491_p0 = pnand %p490_p12, %p484_p7 }
  0x5f   : > { %494 = shalt.err (!%p491_p0)
}
  0x60   : > { %s572_s23 = smov 128   ;;  %s573_s10 = smov 8  }
  0x61   : > { %356 = dma.vmem_to_hbm [thread:$0]  (%p835_p9), %s766_s9, 256, %s771_s4, %s227_s5, %s572_s23, %s572_s23, %s573_s10  }
  0x62 PF: > { %p367_p11 = scmp.ge.s32.totalorder %s565_s13, 2  ;;  %s257_s2 = sand.u32 1, %s537_s6  }
  0x63   : > { %p836_p13 = scmp.ne.s32.totalorder %s833_s25, 0  ;;  %s258_s26 = scalar_lea.sflag [#allocation4], %s257_s2 }
  0x65   : > { %p363_p1 = pnand %p367_p11, %p836_p13 }
  0x67   : > { %532 = dma.done.wait (!%p363_p1), %s258_s26, 256  }
  0x68   : > { %534 = vsyncadd (!%p363_p1), %s258_s26, 4294967040  ;;  %s17_s13 = sadd.s32 1, %s565_s13   ;;  %s837_s6 = smov %s541_s7 }
  0x69   : > { %p14_p3 = scmp.ge.s32.totalorder %s17_s13, 10   ;;  %s838_s7 = smov %s545_s8 }
  0x6a   : > { %s839_s8 = smov %s662_s27  ;;  %s840_s9 = smov %s557_s11 }
  0x6b   : > { %s841_s10 = smov %s561_s12  ;;  %s842_s11 = smov %s845_s16 }
  0x6c   : > { %s843_s12 = smov %s849_s17  ;;  %16 = sbr.rel (!%p14_p3) target bundleno = 7 (0x7), region = 73 }
  0x73   :  { %263 = vsyncpa [#allocation3], 1 }
  0x74   :  { %265 = vsyncpa [#allocation3 + $0x1], 1 }
  0x75   :  { %266 = vsyncpa [#allocation4], 1 }
  0x76   :  { %268 = vsyncpa [#allocation4 + $0x1], 1 }

</bundles_post_ra>
